<compile_context>
chip_gen: v5e
topology: v5e:2x2
jax: 0.10.0
libtpu: 0.0.40
codegen_flags: <defaults>
</compile_context>

<pallas_src>
import functools
import math

import jax
import jax.numpy as jnp
from jax.experimental import pallas as pl
from jax.experimental.pallas import tpu as pltpu


def _count_sketch2_kernel(x_ref, y_ref, a1r_ref, a1i_ref, a2r_ref, a2i_ref,
                          br_ref, bi_ref, o_ref):
    x = x_ref[...]
    y = y_ref[...]
    # Forward DFT of both count sketches (sketch matrices pre-folded into A*).
    xr = jnp.dot(x, a1r_ref[...], preferred_element_type=jnp.float32)
    xi = jnp.dot(x, a1i_ref[...], preferred_element_type=jnp.float32)
    yr = jnp.dot(y, a2r_ref[...], preferred_element_type=jnp.float32)
    yi = jnp.dot(y, a2i_ref[...], preferred_element_type=jnp.float32)
    # Pointwise complex multiply in the frequency domain (VPU, fp32).
    pr = xr * yr - xi * yi
    pi = xr * yi + xi * yr
    # Real part of the inverse DFT, again as MXU matmuls.
    cd = br_ref.dtype
    out = jnp.dot(pr.astype(cd), br_ref[...], preferred_element_type=jnp.float32)
    out = out + jnp.dot(pi.astype(cd), bi_ref[...], preferred_element_type=jnp.float32)
    o_ref[...] = out.astype(o_ref.dtype)


def _cos_sin_rows(row_idx, output_dim):
    """cos/sin(2*pi*row*k/D) with exact integer (row*k) mod D for accuracy."""
    k = jnp.arange(output_dim, dtype=jnp.int32)
    m = (row_idx.astype(jnp.int32)[:, None] * k[None, :]) % output_dim
    ang = m.astype(jnp.float32) * (2.0 * math.pi / output_dim)
    return jnp.cos(ang), jnp.sin(ang)


def make_count_sketch2_params(indx1, sign1, indx2, sign2, output_dim,
                              dtype=jnp.float32):
    """Fold the +/-1 count-sketch matrices into forward-DFT matrices, and build
    the inverse-DFT (real-part) matrices. Done once, outside the kernel."""
    D = output_dim

    def fold(indx, sign):
        c, s = _cos_sin_rows(indx, D)
        sgn = sign.astype(jnp.float32)[:, None]
        # forward DFT uses exp(-2*pi*i*j*k/D)
        return (sgn * c).astype(dtype), (-sgn * s).astype(dtype)

    a1r, a1i = fold(indx1, sign1)
    a2r, a2i = fold(indx2, sign2)

    c, s = _cos_sin_rows(jnp.arange(D, dtype=jnp.int32), D)
    # Re(ifft(P))[n] = (1/D) * sum_k (Pr[k] cos(2*pi*k*n/D) - Pi[k] sin(2*pi*k*n/D))
    br = (c / D).astype(dtype)
    bi = (-s / D).astype(dtype)
    return a1r, a1i, a2r, a2i, br, bi


def count_sketch2_forward(x, y, indx1, sign1, indx2, sign2, output_dim,
                          *, block_b=8, compute_dtype=jnp.float32):
    """Pallas TPU implementation of CountSketch2.forward."""
    n, d1 = x.shape
    n2, d2 = y.shape
    assert n == n2, "x and y must have the same batch size"
    D = output_dim

    a1r, a1i, a2r, a2i, br, bi = make_count_sketch2_params(
        indx1, sign1, indx2, sign2, D, dtype=compute_dtype)

    xb = x.astype(compute_dtype)
    yb = y.astype(compute_dtype)

    grid = (pl.cdiv(n, block_b),)

    flops = 4 * n * D * (d1 + d2 + D) + 6 * n * D
    operands = (xb, yb, a1r, a1i, a2r, a2i, br, bi)
    bytes_accessed = sum(int(a.size) * a.dtype.itemsize for a in operands) + n * D * 4

    in_specs = [
        pl.BlockSpec((block_b, d1), lambda i: (i, 0)),
        pl.BlockSpec((block_b, d2), lambda i: (i, 0)),
        pl.BlockSpec((d1, D), lambda i: (0, 0)),
        pl.BlockSpec((d1, D), lambda i: (0, 0)),
        pl.BlockSpec((d2, D), lambda i: (0, 0)),
        pl.BlockSpec((d2, D), lambda i: (0, 0)),
        pl.BlockSpec((D, D), lambda i: (0, 0)),
        pl.BlockSpec((D, D), lambda i: (0, 0)),
    ]
    out_specs = pl.BlockSpec((block_b, D), lambda i: (i, 0))

    return pl.pallas_call(
        _count_sketch2_kernel,
        out_shape=jax.ShapeDtypeStruct((n, D), jnp.float32),
        grid=grid,
        in_specs=in_specs,
        out_specs=out_specs,
        compiler_params=pltpu.CompilerParams(
            dimension_semantics=("parallel",),
        ),
        cost_estimate=pl.CostEstimate(
            flops=int(flops), transcendentals=0,
            bytes_accessed=int(bytes_accessed)),
    )(*operands)


if __name__ == "__main__":
    # Module config (synthetic, deterministic init — no checkpoint loading).
    input_dim1 = 32
    input_dim2 = 24
    output_dim = 128
    n = 16

    key = jax.random.PRNGKey(0)
    kx, ky, ks1, ki1, ks2, ki2 = jax.random.split(key, 6)
    x = jax.random.normal(kx, (n, input_dim1), dtype=jnp.float32)
    y = jax.random.normal(ky, (n, input_dim2), dtype=jnp.float32)
    # torch.randint(2, (d,)) * 2 - 1  and  torch.randint(output_dim, (d,))
    sign1 = jax.random.randint(ks1, (input_dim1,), 0, 2, dtype=jnp.int32) * 2 - 1
    indx1 = jax.random.randint(ki1, (input_dim1,), 0, output_dim, dtype=jnp.int32)
    sign2 = jax.random.randint(ks2, (input_dim2,), 0, 2, dtype=jnp.int32) * 2 - 1
    indx2 = jax.random.randint(ki2, (input_dim2,), 0, output_dim, dtype=jnp.int32)

    # fp32 path (bit-for-bit faithful) and bf16-operand path (bandwidth-optimized).
    out_f32 = count_sketch2_forward(x, y, indx1, sign1, indx2, sign2, output_dim,
                                    block_b=8, compute_dtype=jnp.float32)
    out_bf16 = count_sketch2_forward(x, y, indx1, sign1, indx2, sign2, output_dim,
                                     block_b=8, compute_dtype=jnp.bfloat16)
    jax.block_until_ready((out_f32, out_bf16))

    # Pure-JAX reference: scatter-add count sketch + FFT circular convolution.
    def count_sketch_ref(v, indx, sign):
        vs = v * sign[None, :].astype(v.dtype)
        z = jnp.zeros((v.shape[0], output_dim), v.dtype)
        return z.at[:, indx].add(vs)

    x_cs = count_sketch_ref(x, indx1, sign1)
    y_cs = count_sketch_ref(y, indx2, sign2)
    ref = jnp.fft.ifft(jnp.fft.fft(x_cs, axis=-1) * jnp.fft.fft(y_cs, axis=-1),
                       axis=-1).real

    err_f32 = float(jnp.max(jnp.abs(out_f32 - ref)))
    err_bf16 = float(jnp.max(jnp.abs(out_bf16 - ref)))
    assert jnp.allclose(out_f32, ref, atol=2e-3, rtol=2e-3), err_f32
    assert jnp.allclose(out_bf16, ref, atol=0.5, rtol=0.1), err_bf16

    print("KERNEL_OK")
</pallas_src>

<mosaic_0001>
module attributes {stable_mosaic.version = 11 : i64} {
  func.func @_count_sketch2_kernel(%arg0: i32, %arg1: memref<8x32xf32, #tpu.memory_space<vmem>>, %arg2: memref<8x24xf32, #tpu.memory_space<vmem>>, %arg3: memref<32x128xf32, #tpu.memory_space<vmem>>, %arg4: memref<32x128xf32, #tpu.memory_space<vmem>>, %arg5: memref<24x128xf32, #tpu.memory_space<vmem>>, %arg6: memref<24x128xf32, #tpu.memory_space<vmem>>, %arg7: memref<128x128xf32, #tpu.memory_space<vmem>>, %arg8: memref<128x128xf32, #tpu.memory_space<vmem>>, %arg9: memref<8x128xf32, #tpu.memory_space<vmem>>) attributes {dimension_semantics = [#tpu.dimension_semantics<parallel>], iteration_bounds = array<i64: 2>, scalar_prefetch = 0 : i64, scratch_operands = 0 : i64, tpu.core_type = #tpu.core_type<tc>, window_params = [{transform_indices = @transform_0, window_bounds = array<i64: 8, 32>}, {transform_indices = @transform_1, window_bounds = array<i64: 8, 24>}, {pipeline_mode = #tpu.pipeline_mode<synchronous>, transform_indices = @transform_2, window_bounds = array<i64: 32, 128>}, {pipeline_mode = #tpu.pipeline_mode<synchronous>, transform_indices = @transform_3, window_bounds = array<i64: 32, 128>}, {pipeline_mode = #tpu.pipeline_mode<synchronous>, transform_indices = @transform_4, window_bounds = array<i64: 24, 128>}, {pipeline_mode = #tpu.pipeline_mode<synchronous>, transform_indices = @transform_5, window_bounds = array<i64: 24, 128>}, {pipeline_mode = #tpu.pipeline_mode<synchronous>, transform_indices = @transform_6, window_bounds = array<i64: 128, 128>}, {pipeline_mode = #tpu.pipeline_mode<synchronous>, transform_indices = @transform_7, window_bounds = array<i64: 128, 128>}, {transform_indices = @transform_8, window_bounds = array<i64: 8, 128>}]} {
    %c0 = arith.constant 0 : index
    %c0_0 = arith.constant 0 : index
    %0 = vector.load %arg1[%c0, %c0_0] : memref<8x32xf32, #tpu.memory_space<vmem>>, vector<8x32xf32>
    %c0_1 = arith.constant 0 : index
    %c0_2 = arith.constant 0 : index
    %1 = vector.load %arg2[%c0_1, %c0_2] : memref<8x24xf32, #tpu.memory_space<vmem>>, vector<8x24xf32>
    %c0_3 = arith.constant 0 : index
    %c0_4 = arith.constant 0 : index
    %2 = vector.load %arg3[%c0_3, %c0_4] : memref<32x128xf32, #tpu.memory_space<vmem>>, vector<32x128xf32>
    %cst = arith.constant dense<0.000000e+00> : vector<8x128xf32>
    %3 = tpu.matmul %0, %2, %cst {dimension_numbers = #tpu.dot_dimension_numbers<[1], [0], [0], [1], [0, 0, 1, 1], [], []>} : vector<8x32xf32>, vector<32x128xf32>, vector<8x128xf32> -> vector<8x128xf32>
    %c0_5 = arith.constant 0 : index
    %c0_6 = arith.constant 0 : index
    %4 = vector.load %arg4[%c0_5, %c0_6] : memref<32x128xf32, #tpu.memory_space<vmem>>, vector<32x128xf32>
    %cst_7 = arith.constant dense<0.000000e+00> : vector<8x128xf32>
    %5 = tpu.matmul %0, %4, %cst_7 {dimension_numbers = #tpu.dot_dimension_numbers<[1], [0], [0], [1], [0, 0, 1, 1], [], []>} : vector<8x32xf32>, vector<32x128xf32>, vector<8x128xf32> -> vector<8x128xf32>
    %c0_8 = arith.constant 0 : index
    %c0_9 = arith.constant 0 : index
    %6 = vector.load %arg5[%c0_8, %c0_9] : memref<24x128xf32, #tpu.memory_space<vmem>>, vector<24x128xf32>
    %cst_10 = arith.constant dense<0.000000e+00> : vector<8x128xf32>
    %7 = tpu.matmul %1, %6, %cst_10 {dimension_numbers = #tpu.dot_dimension_numbers<[1], [0], [0], [1], [0, 0, 1, 1], [], []>} : vector<8x24xf32>, vector<24x128xf32>, vector<8x128xf32> -> vector<8x128xf32>
    %c0_11 = arith.constant 0 : index
    %c0_12 = arith.constant 0 : index
    %8 = vector.load %arg6[%c0_11, %c0_12] : memref<24x128xf32, #tpu.memory_space<vmem>>, vector<24x128xf32>
    %cst_13 = arith.constant dense<0.000000e+00> : vector<8x128xf32>
    %9 = tpu.matmul %1, %8, %cst_13 {dimension_numbers = #tpu.dot_dimension_numbers<[1], [0], [0], [1], [0, 0, 1, 1], [], []>} : vector<8x24xf32>, vector<24x128xf32>, vector<8x128xf32> -> vector<8x128xf32>
    %10 = arith.mulf %3, %7 : vector<8x128xf32>
    %11 = arith.mulf %5, %9 : vector<8x128xf32>
    %12 = arith.subf %10, %11 : vector<8x128xf32>
    %13 = arith.mulf %3, %9 : vector<8x128xf32>
    %14 = arith.mulf %5, %7 : vector<8x128xf32>
    %15 = arith.addf %13, %14 : vector<8x128xf32>
    %c0_14 = arith.constant 0 : index
    %c0_15 = arith.constant 0 : index
    %16 = vector.load %arg7[%c0_14, %c0_15] : memref<128x128xf32, #tpu.memory_space<vmem>>, vector<128x128xf32>
    %cst_16 = arith.constant dense<0.000000e+00> : vector<8x128xf32>
    %17 = tpu.matmul %12, %16, %cst_16 {dimension_numbers = #tpu.dot_dimension_numbers<[1], [0], [0], [1], [0, 0, 1, 1], [], []>} : vector<8x128xf32>, vector<128x128xf32>, vector<8x128xf32> -> vector<8x128xf32>
    %c0_17 = arith.constant 0 : index
    %c0_18 = arith.constant 0 : index
    %18 = vector.load %arg8[%c0_17, %c0_18] : memref<128x128xf32, #tpu.memory_space<vmem>>, vector<128x128xf32>
    %cst_19 = arith.constant dense<0.000000e+00> : vector<8x128xf32>
    %19 = tpu.matmul %15, %18, %cst_19 {dimension_numbers = #tpu.dot_dimension_numbers<[1], [0], [0], [1], [0, 0, 1, 1], [], []>} : vector<8x128xf32>, vector<128x128xf32>, vector<8x128xf32> -> vector<8x128xf32>
    %20 = arith.addf %17, %19 : vector<8x128xf32>
    %c0_20 = arith.constant 0 : index
    %c0_21 = arith.constant 0 : index
    %21 = vector.load %arg9[%c0_20, %c0_21] : memref<8x128xf32, #tpu.memory_space<vmem>>, vector<8x128xf32>
    tpu.vector_store %arg9[%c0_20, %c0_21], %20 {strides = array<i32>} : memref<8x128xf32, #tpu.memory_space<vmem>>, vector<8x128xf32>,
    return
  }
  func.func @transform_0(%arg0: i32) -> (i32, i32) {
    %c0_i32 = arith.constant 0 : i32
    %c0_i32_0 = arith.constant 0 : i32
    return %arg0, %c0_i32 : i32, i32
  }
  func.func @transform_1(%arg0: i32) -> (i32, i32) {
    %c0_i32 = arith.constant 0 : i32
    %c0_i32_0 = arith.constant 0 : i32
    return %arg0, %c0_i32 : i32, i32
  }
  func.func @transform_2(%arg0: i32) -> (i32, i32) {
    %c0_i32 = arith.constant 0 : i32
    %c0_i32_0 = arith.constant 0 : i32
    %c0_i32_1 = arith.constant 0 : i32
    return %c0_i32, %c0_i32_0 : i32, i32
  }
  func.func @transform_3(%arg0: i32) -> (i32, i32) {
    %c0_i32 = arith.constant 0 : i32
    %c0_i32_0 = arith.constant 0 : i32
    %c0_i32_1 = arith.constant 0 : i32
    return %c0_i32, %c0_i32_0 : i32, i32
  }
  func.func @transform_4(%arg0: i32) -> (i32, i32) {
    %c0_i32 = arith.constant 0 : i32
    %c0_i32_0 = arith.constant 0 : i32
    %c0_i32_1 = arith.constant 0 : i32
    return %c0_i32, %c0_i32_0 : i32, i32
  }
  func.func @transform_5(%arg0: i32) -> (i32, i32) {
    %c0_i32 = arith.constant 0 : i32
    %c0_i32_0 = arith.constant 0 : i32
    %c0_i32_1 = arith.constant 0 : i32
    return %c0_i32, %c0_i32_0 : i32, i32
  }
  func.func @transform_6(%arg0: i32) -> (i32, i32) {
    %c0_i32 = arith.constant 0 : i32
    %c0_i32_0 = arith.constant 0 : i32
    %c0_i32_1 = arith.constant 0 : i32
    return %c0_i32, %c0_i32_0 : i32, i32
  }
  func.func @transform_7(%arg0: i32) -> (i32, i32) {
    %c0_i32 = arith.constant 0 : i32
    %c0_i32_0 = arith.constant 0 : i32
    %c0_i32_1 = arith.constant 0 : i32
    return %c0_i32, %c0_i32_0 : i32, i32
  }
  func.func @transform_8(%arg0: i32) -> (i32, i32) {
    %c0_i32 = arith.constant 0 : i32
    %c0_i32_0 = arith.constant 0 : i32
    return %arg0, %c0_i32 : i32, i32
  }
}

</mosaic_0001>

<bundles_post_ra>
// kernel: tpu_custom_call.1
= control target key start
LH: loop header
LB: loop body
LE: loop exit
PB: predicated region body
PF: predicated region fallthrough
CT: control target
= control target key end

     0   :  { %s1573_s0 = inlined_call_operand.hbm [shape: f32[16,32], index: 0, kind: input, shape index: {}]   ;;  %s1574_s1 = inlined_call_operand.hbm [shape: f32[16,24], index: 1, kind: input, shape index: {}]   ;;  %s1575_s2 = inlined_call_operand.hbm [shape: f32[32,128], index: 2, kind: input, shape index: {}]   ;;  %s1576_s3 = inlined_call_operand.hbm [shape: f32[32,128], index: 3, kind: input, shape index: {}]   ;;  %s1577_s4 = inlined_call_operand.hbm [shape: f32[24,128], index: 4, kind: input, shape index: {}]   ;;  %s1578_s5 = inlined_call_operand.hbm [shape: f32[24,128], index: 5, kind: input, shape index: {}]   ;;  %s1579_s6 = inlined_call_operand.hbm [shape: f32[128,128], index: 6, kind: input, shape index: {}]   ;;  %s1580_s7 = inlined_call_operand.hbm [shape: f32[128,128], index: 7, kind: input, shape index: {}]   ;;  %s1581_s8 = inlined_call_operand.hbm [shape: f32[16,128], index: 8, kind: output, shape index: {}]  }
   0x1   :  { %1582 = sst [smem:[#allocation25_spill]] %s1575_s2 }
   0x2   :  { %1583 = sst [smem:[#allocation26_spill]] %s1576_s3 }
   0x3   :  { %1584 = sst [smem:[#allocation27_spill]] %s1577_s4 }
   0x4   :  { %1585 = sst [smem:[#allocation28_spill]] %s1578_s5 }
   0x5   :  { %1586 = sst [smem:[#allocation29_spill]] %s1579_s6 }
   0x6   :  { %1587 = sst [smem:[#allocation30_spill]] %s1580_s7 }
   0x7   :  { %13 = vsyncpa [#allocation3], 0 }
   0x8   :  { %15 = vsyncpa [#allocation3 + $0x1], 0 }
   0x9   :  { %16 = vsyncpa [#allocation6], 0 }
   0xa   :  { %18 = vsyncpa [#allocation6 + $0x1], 0 }
   0xb   :  { %19 = vsyncpa [#allocation9], 0 }
   0xc   :  { %20 = vsyncpa [#allocation12], 0 }
   0xd   :  { %21 = vsyncpa [#allocation15], 0 }
   0xe   :  { %22 = vsyncpa [#allocation4], 0 }
   0xf   :  { %24 = vsyncpa [#allocation4 + $0x1], 0  ;;  %s1336_s27 = smov 0   ;;  %s1338_s28 = smov 0  }
  0x10   :  { %s1340_s29 = smov 0   ;;  %s1342_s30 = smov 0  }
  0x11 LB: > { %s1588_s2 = sld [smem:[#allocation25_spill]]  ;;  %s1360_s12 = sadd.s32 4294967295, %s1281_s30   ;;  %s1281_s30 = sphi %s1342_s30, %s1607_s30   ;;  %s1277_s29 = sphi %s1340_s29, %s1606_s29   ;;  %s1273_s28 = sphi %s1338_s28, %s1605_s28   ;;  %s1269_s27 = sphi %s1336_s27, %s1604_s27  }
  0x12   : > { %p811_p0 = scmp.ge.s32.totalorder %s1281_s30, 1  ;;  %p51_p1 = scmp.eq.s32.totalorder %s1360_s12, 0 }
  0x13   : > { %p239_p2 = scmp.lt.s32.totalorder %s1281_s30, 3  ;;  %s1283_s14 = smov [#allocation7]  }
  0x14   : > { %s252_s15 = sshll.u32 %s1283_s14, 4  ;;  %s1590_s3 = sld [smem:[#allocation26_spill]]  ;;  %s253_s15 = int_to_ptr.vmem [resolvable:$true] %s252_s15 }
  0x15   : > { %p1365_p3 = pnand %p811_p0, %p239_p2  ;;  %s1592_s5 = sld [smem:[#allocation28_spill]] }
  0x16   : > { %s1284_s23 = smov [#allocation8]   ;;  %s1285_s25 = smov 128  }
  0x17   : > { %s250_s11 = sshll.u32 %s1588_s2, 4  ;;  %p871_p4 = pneg %p1365_p3  ;;  %s251_s11 = int_to_ptr.hbm [resolvable:$true] %s250_s11 }
  0x18   : > { %s266_s24 = sshll.u32 %s1284_s23, 4  ;;  %s1286_s26 = smov 8   ;;  %s267_s24 = int_to_ptr.vmem [resolvable:$true] %s266_s24 }
  0x19   : > { %p1377_p6 = pnand %p871_p4, %p51_p1  ;;  %s1593_s4 = sld [smem:[#allocation27_spill]] }
  0x1a   : > { %s264_s18 = sshll.u32 %s1590_s3, 4  ;;  %s1287_s16 = smov [#allocation11]   ;;  %s265_s18 = int_to_ptr.hbm [resolvable:$true] %s264_s18 }
  0x1b   : > { %s292_s22 = sshll.u32 %s1592_s5, 4  ;;  %s294_s17 = sshll.u32 %s1287_s16, 4  ;;  %s293_s22 = int_to_ptr.hbm [resolvable:$true] %s292_s22  ;;  %s295_s17 = int_to_ptr.vmem [resolvable:$true] %s294_s17 }
  0x1c   : > { %874 = dma.hbm_to_vmem [thread:$0]  (!%p1377_p6), %s251_s11, 512, %s253_s15, [#allocation6], %s1285_s25, %s1285_s25, %s1286_s26  }
  0x1d   : > { %877 = dma.hbm_to_vmem [thread:$0]  (!%p1377_p6), %s265_s18, 512, %s267_s24, [#allocation9], %s1285_s25, %s1285_s25, %s1286_s26  }
  0x1e   : > { %883 = dma.hbm_to_vmem [thread:$0]  (!%p1377_p6), %s293_s22, 384, %s295_s17, [#allocation12], %s1285_s25, %s1285_s25, %s1286_s26  }
  0x1f   : > { %s278_s14 = sshll.u32 %s1593_s4, 4  ;;  %s1288_s11 = smov [#allocation10]   ;;  %s279_s14 = int_to_ptr.hbm [resolvable:$true] %s278_s14 }
  0x20   : > { %s280_s15 = sshll.u32 %s1288_s11, 4  ;;  %s1594_s6 = sld [smem:[#allocation29_spill]]  ;;  %s281_s15 = int_to_ptr.vmem [resolvable:$true] %s280_s15 }
  0x21   : > { %880 = dma.hbm_to_vmem [thread:$0]  (!%p1377_p6), %s279_s14, 384, %s281_s15, [#allocation9], %s1285_s25, %s1285_s25, %s1286_s26  }
  0x22   : > { %s1595_s7 = sld [smem:[#allocation30_spill]]  ;;  %s1289_s9 = smov [#allocation13]  }
  0x23   : > { %s308_s10 = sshll.u32 %s1289_s9, 4  ;;  %s1290_s14 = smov [#allocation14]   ;;  %s309_s10 = int_to_ptr.vmem [resolvable:$true] %s308_s10 }
  0x24   : > { %s322_s16 = sshll.u32 %s1290_s14, 4  ;;  %s810_s17 = sadd.s32 4294967294, %s1281_s30   ;;  %s323_s16 = int_to_ptr.vmem [resolvable:$true] %s322_s16 }
  0x25   : > { %s1425_s11 = sadd.s32 1, %s1281_s30   ;;  %s37_s20 = sadd.s32 1, %s1277_s29 }
  0x26   : > { %s306_s21 = sshll.u32 %s1594_s6, 4  ;;  %s34_s15 = ssub.s32 %s1281_s30, %s1425_s11  ;;  %s307_s21 = int_to_ptr.hbm [resolvable:$true] %s306_s21 }
  0x27   : > { %886 = dma.hbm_to_vmem [thread:$0]  (!%p1377_p6), %s307_s21, 2048, %s309_s10, [#allocation12], %s1285_s25, %s1285_s25, %s1286_s26  }
  0x28   : > { %s320_s24 = sshll.u32 %s1595_s7, 4  ;;  %p35_p7 = scmp.eq.s32.totalorder %s34_s15, 0  ;;  %s321_s24 = int_to_ptr.hbm [resolvable:$true] %s320_s24 }
  0x29   : > { %889 = dma.hbm_to_vmem [thread:$0]  (!%p1377_p6), %s321_s24, 2048, %s323_s16, [#allocation15], %s1285_s25, %s1285_s25, %s1286_s26  }
  0x2a   : > { %p44_p8 = scmp.ne.s32.totalorder %s1277_s29, %s1273_s28  ;;  %p45_p9 = scmp.eq.s32.totalorder %s1281_s30, 0 }
  0x2b   : > { %p50_p10 = scmp.ne.s32.totalorder %s1273_s28, %s1269_s27  ;;  %p226_p13 = scmp.eq.s32.totalorder %s1360_s12, 1 }
  0x2c   : > { %s1436_s18 = scalar_select %p35_p7, %s1277_s29, %s37_s20  }
  0x2d   : > { %p1438_p11 = por %p45_p9, %p44_p8  ;;  %p1444_p12 = por %p51_p1, %p50_p10 }
  0x2e   : > { %1596 = sst [smem:[#allocation24_spill]] %s1436_s18  ;;  %p232_p0 = scmp.eq.s32.totalorder %s810_s17, 1 }
  0x2f   : > { %p907_p2 = scmp.lt.s32.totalorder %s1281_s30, 2  ;;  %s336_s26 = sand.u32 1, %s1277_s29  }
  0x30   : > { %p1451_p4 = por %p226_p13, %p44_p8  ;;  %p1455_p6 = por %p232_p0, %p50_p10 }
  0x31   : > { %s1459_s22 = sshll.u32 %s336_s26, 3  ;;  %s820_s24 = sshll.u32 %s1281_s30, 3 }
  0x32   : > { %s344_s14 = scalar_lea.hbm %s1573_s0, %s820_s24  ;;  %s340_s16 = scalar_lea.vmem [#allocation2], %s1459_s22 }
  0x33   : > { %s348_s17 = sshll.u32 %s340_s16, 4  ;;  %s346_s15 = sshll.u32 %s344_s14, 4  ;;  %s349_s17 = int_to_ptr.vmem [resolvable:$true] %s348_s17  ;;  %s347_s15 = int_to_ptr.hbm [resolvable:$true] %s346_s15 }
  0x34   : > { %p1468_p7 = pnand %p907_p2, %p1438_p11  ;;  %s363_s4 = scalar_lea.hbm %s1574_s1, %s820_s24 }
  0x35   : > { %s355_s5 = sand.u32 1, %s1281_s30   ;;  %s337_s6 = scalar_lea.sflag [#allocation3], %s336_s26 }
  0x36   : > { %s1135_s9 = sshra.s32 %s347_s15, 4  ;;  %p1139_p9 = pneg %p1468_p7  ;;  %s1136_s9 = int_to_ptr.hbm [resolvable:$true] %s1135_s9 }
  0x37   : > { %s1137_s10 = scalar_lea.hbm %s1136_s9, 8  ;;  %s1142_s16 = scalar_lea.hbm %s1573_s0, 16 }
  0x38   : > { %p1138_p8 = scmp.ne.s32.totalorder %s1136_s9, %s1137_s10  ;;  %p1143_p13 = scmp.lt.s32.totalorder %s1136_s9, %s1573_s0 }
  0x39   : > { %p1144_p0 = scmp.lt.s32.totalorder %s1142_s16, %s1137_s10 }
  0x3a   : > { %p1140_p10 = pnand %p1139_p9, %p1138_p8 }
  0x3b   : > { %p1145_p2 = por %p1144_p0, %p1143_p13 }
  0x3c   : > { %p1141_p11 = pneg %p1140_p10 }
  0x3e   : > { %p1146_p5 = pnand %p1145_p2, %p1141_p11 }
  0x40   : > { %1149 = shalt.err (!%p1146_p5)
}
  0x41   : > { %893 = dma.hbm_to_vmem [thread:$0]  (!%p1468_p7), %s347_s15, 128, %s349_s17, %s337_s6  }
  0x42   : > { %s365_s26 = sshll.u32 %s363_s4, 4  ;;  %s359_s24 = scalar_lea.vmem [#allocation5], %s1459_s22  ;;  %s366_s26 = int_to_ptr.hbm [resolvable:$true] %s365_s26 }
  0x43   : > { %s367_s7 = sshll.u32 %s359_s24, 4  ;;  %s356_s19 = scalar_lea.sflag [#allocation6], %s355_s5  ;;  %s368_s7 = int_to_ptr.vmem [resolvable:$true] %s367_s7 }
  0x44   : > { %s1165_s14 = sshra.s32 %s366_s26, 4  ;;  %s1172_s16 = scalar_lea.hbm %s1574_s1, 16  ;;  %s1166_s14 = int_to_ptr.hbm [resolvable:$true] %s1165_s14 }
  0x45   : > { %s1167_s18 = scalar_lea.hbm %s1166_s14, 8  ;;  %p1173_p5 = scmp.lt.s32.totalorder %s1166_s14, %s1574_s1 }
  0x46   : > { %p1168_p8 = scmp.ne.s32.totalorder %s1166_s14, %s1167_s18  ;;  %p1174_p13 = scmp.lt.s32.totalorder %s1172_s16, %s1167_s18 }
  0x48   : > { %p1170_p10 = pnand %p1168_p8, %p1139_p9  ;;  %p1175_p0 = por %p1174_p13, %p1173_p5 }
  0x4a   : > { %p1171_p11 = pneg %p1170_p10 }
  0x4c   : > { %p1176_p2 = pnand %p1175_p0, %p1171_p11 }
  0x4e   : > { %1179 = shalt.err (!%p1176_p2)
}
  0x4f   : > { %896 = dma.hbm_to_vmem [thread:$0]  (!%p1468_p7), %s366_s26, 128, %s368_s7, %s356_s19  }
  0x50   : > { %376 = sbr.rel (%p1365_p3) target bundleno = 381 (0x17d), region = 52  ;;  %s1504_s4 = sand.u32 (!%p1365_p3), 1, %s1273_s28  }
  0x51   : > { %s1507_s5 = sshll.u32 (!%p1365_p3), %s1504_s4, 3  ;;  %s379_s22 = scalar_lea.sflag (!%p1365_p3), [#allocation3], %s1504_s4 }
  0x52   : > { %s382_s18 = scalar_lea.vmem (!%p1365_p3), [#allocation2], %s1507_s5 }
  0x55   : > { %1240 = dma.done.wait (%p1444_p12), %s379_s22, 128  }
  0x56   : > { %1242 = vsyncadd (%p1444_p12), %s379_s22, 4294967168  ;;  %s388_s7 = sand.u32 1, %s1360_s12   ;;  %s392_s17 = scalar_lea.vmem [#allocation5], %s1507_s5 }
  0x57   : > { %s389_s13 = scalar_lea.sflag [#allocation6], %s388_s7 }
  0x58   : > { %1244 = dma.done.wait (%p1444_p12), %s389_s13, 128  }
  0x59   : > { %1246 = vsyncadd (%p1444_p12), %s389_s13, 4294967168 }
  0x5a   : > { %1248 = dma.done.wait (%p51_p1), [#allocation6], 512  }
  0x5b   : > { %1250 = vsyncadd (%p51_p1), [#allocation6], 4294966784 }
  0x5c   : > { %1252 = dma.done.wait (%p51_p1), [#allocation9], 896  }
  0x5d   : > { %1254 = vsyncadd (%p51_p1), [#allocation9], 4294966400 }
  0x5e   : > { %1256 = dma.done.wait (%p51_p1), [#allocation12], 2432  }
  0x5f   : > { %1258 = vsyncadd (%p51_p1), [#allocation12], 4294964864 }
  0x60   : > { %1260 = dma.done.wait (%p51_p1), [#allocation15], 2048  }
  0x61   : > { %1262 = vsyncadd (%p51_p1), [#allocation15], 4294965248  ;;  %v466_v0 = vld [vmem:[#allocation7 + $0x18] sm:$0xff]  ;;  %v465_v2 = vld [vmem:[#allocation7 + $0x10] sm:$0xff]  ;;  %vm467_vm0 = vcmask 261120   ;;  %vm518_vm1 = vcmask 195584  }
  0x62   : > { %v494_v1 = vld [vmem:[#allocation8 + $0x18] sm:$0xff]  ;;  %483 = vmatpush.msra.mxu0 %v466_v0  ;;  %v493_v3 = vld [vmem:[#allocation8 + $0x10] sm:$0xff]  ;;  %v464_v4 = vld [vmem:[#allocation7 + $0x8] sm:$0xff]  ;;  %s838_s25 = sshll.u32 %s1360_s12, 3  ;;  %s460_s26 = scalar_lea.vmem [#allocation16], %s1507_s5 }
  0x63   : > { %507 = vmatpush.msra.mxu1 %v494_v1  ;;  %v492_v5 = vld [vmem:[#allocation8 + $0x8] sm:$0xff]  ;;  %v463_v6 = vld [vmem:[#allocation7] sm:$0xff]  ;;  %v517_v11 = vld [vmem:[#allocation10 + $0x10] sm:$0xff]  ;;  %s655_s3 = scalar_lea.hbm %s1581_s8, %s838_s25  ;;  %s657_s24 = sshll.u32 %s460_s26, 4  ;;  %s658_s24 = int_to_ptr.vmem [resolvable:$true] %s657_s24 }
  0x64   : > { %484 = vmatpush.msra.mxu0 %v465_v2  ;;  %v491_v7 = vld [vmem:[#allocation8] sm:$0xff]  ;;  %v602_v9 = vld [vmem:[#allocation14 + $0x78] sm:$0xff]  ;;  %v600_v17 = vld [vmem:[#allocation14 + $0x68] sm:$0xff]  ;;  %s659_s19 = sshll.u32 %s655_s3, 4  ;;  %s645_s14 = scalar_lea.sflag [#allocation4], %s1504_s4  ;;  %s660_s19 = int_to_ptr.hbm [resolvable:$true] %s659_s19 }
  0x65   : > { %508 = vmatpush.msra.mxu1 %v493_v3  ;;  %v461_v8 = vld [vmem:[%s382_s18] sm:$0xff]  ;;  %603 = vmatpush.msra.mxu2 %v602_v9  ;;  %v584_v18 = vld [vmem:[#allocation13 + $0x68] sm:$0xff]  ;;  %v599_v21 = vld [vmem:[#allocation14 + $0x60] sm:$0xff]  ;;  %s1209_s9 = sshra.s32 %s660_s19, 4  ;;  %s1215_s2 = scalar_lea.hbm %s1581_s8, 16  ;;  %s1210_s9 = int_to_ptr.hbm [resolvable:$true] %s1209_s9 }
  0x66   : > { %485 = vmatpush.msra.mxu0 %v464_v4  ;;  %v586_v10 = vld [vmem:[#allocation13 + $0x78] sm:$0xff]  ;;  %v601_v13 = vld [vmem:[#allocation14 + $0x70] sm:$0xff]  ;;  %v542_v20 = vld [vmem:[#allocation11] sm:$0xff]  ;;  %s1211_s10 = scalar_lea.hbm %s1210_s9, 8  ;;  %p1216_p7 = scmp.lt.s32.totalorder %s1210_s9, %s1581_s8 }
  0x67   : > { %509 = vmatpush.msra.mxu1 %v492_v5  ;;  %v544_v12 = vld [vmem:[#allocation11 + $0x10] sm:$0xff]  ;;  %623 = vmatpush.msra.mxu3 %v586_v10  ;;  %v585_v14 = vld [vmem:[#allocation13 + $0x70] sm:$0xff]  ;;  %v583_v22 = vld [vmem:[#allocation13 + $0x60] sm:$0xff]  ;;  %p1212_p1 = scmp.ne.s32.totalorder %s1210_s9, %s1211_s10  ;;  %p1217_p9 = scmp.lt.s32.totalorder %s1215_s2, %s1211_s10 }
  0x68   : > { %486 = vmatpush.msra.mxu0 %v463_v6  ;;  %v516_v15 = vld [vmem:[#allocation10 + $0x8] sm:$0xff]  ;;  %v543_v16 = vld [vmem:[#allocation11 + $0x8] sm:$0xff]  ;;  %604 = vmatpush.msra.mxu2 %v601_v13  ;;  %v462_v23 = vld [vmem:[%s392_s17] sm:$0xff] }
  0x69   : > { %510 = vmatpush.msra.mxu1 %v491_v7  ;;  %833 = vmatmul.msk.f32.vlgmr.msra.gmra.mxu0 %vm467_vm0, %v461_v8  ;;  %v515_v19 = vld [vmem:[#allocation10] sm:$0xff]  ;;  %v598_v24 = vld [vmem:[#allocation14 + $0x58] sm:$0xff]  ;;  %v596_v28 = vld [vmem:[#allocation14 + $0x48] sm:$0xff]  ;;  %p1213_p3 = pnand %p1212_p1, %p1451_p4  ;;  %p1218_p8 = por %p1217_p9, %p1216_p7 }
  0x6a   : > { %834 = vmatmul.msk.f32.vlgmr.msra.gmra.mxu1 %vm467_vm0, %v461_v8  ;;  %535 = vmatpush.msrb.mxu0 %v517_v11  ;;  %v582_v25 = vld [vmem:[#allocation13 + $0x58] sm:$0xff]  ;;  %v597_v26 = vld [vmem:[#allocation14 + $0x50] sm:$0xff]  ;;  %v580_v29 = vld [vmem:[#allocation13 + $0x48] sm:$0xff] }
  0x6b   : > { %558 = vmatpush.msrb.mxu1 %v544_v12  ;;  %624 = vmatpush.msra.mxu3 %v585_v14  ;;  %v581_v27 = vld [vmem:[#allocation13 + $0x50] sm:$0xff]  ;;  %v595_v30 = vld [vmem:[#allocation14 + $0x40] sm:$0xff]  ;;  %v594_v32 = vld [vmem:[#allocation14 + $0x38] sm:$0xff]  ;;  %p1214_p12 = pneg %p1213_p3 }
  0x6c   : > { %536 = vmatpush.msrb.mxu0 %v516_v15  ;;  %605 = vmatpush.msra.mxu2 %v600_v17  ;;  %v579_v31 = vld [vmem:[#allocation13 + $0x40] sm:$0xff]  ;;  %v578_v33 = vld [vmem:[#allocation13 + $0x38] sm:$0xff]  ;;  %v593_v34 = vld [vmem:[#allocation14 + $0x30] sm:$0xff] }
  0x6d   : > { %559 = vmatpush.msrb.mxu1 %v543_v16  ;;  %625 = vmatpush.msra.mxu3 %v584_v18  ;;  %v577_v35 = vld [vmem:[#allocation13 + $0x30] sm:$0xff]  ;;  %v592_v36 = vld [vmem:[#allocation14 + $0x28] sm:$0xff]  ;;  %v591_v38 = vld [vmem:[#allocation14 + $0x20] sm:$0xff]  ;;  %p1219_p10 = pnand %p1218_p8, %p1214_p12 }
  0x6e   : > { %537 = vmatpush.msrb.mxu0 %v515_v19  ;;  %606 = vmatpush.msra.mxu2 %v599_v21  ;;  %v576_v37 = vld [vmem:[#allocation13 + $0x28] sm:$0xff]  ;;  %v575_v39 = vld [vmem:[#allocation13 + $0x20] sm:$0xff]  ;;  %v590_v40 = vld [vmem:[#allocation14 + $0x18] sm:$0xff] }
  0x6f   : > { %560 = vmatpush.msrb.mxu1 %v542_v20  ;;  %626 = vmatpush.msra.mxu3 %v583_v22  ;;  %v574_v41 = vld [vmem:[#allocation13 + $0x18] sm:$0xff]  ;;  %v589_v42 = vld [vmem:[#allocation14 + $0x10] sm:$0xff]  ;;  %v588_v44 = vld [vmem:[#allocation14 + $0x8] sm:$0xff] }
  0x70   : > { %607 = vmatpush.msra.mxu2 %v598_v24  ;;  %v573_v43 = vld [vmem:[#allocation13 + $0x10] sm:$0xff]  ;;  %v572_v45 = vld [vmem:[#allocation13 + $0x8] sm:$0xff]  ;;  %v587_v46 = vld [vmem:[#allocation14] sm:$0xff] }
  0x71   : > { %835 = vmatmul.msk.f32.vlgmr.msrb.gmra.mxu0 %vm518_vm1, %v462_v23  ;;  %627 = vmatpush.msra.mxu3 %v582_v25  ;;  %v571_v47 = vld [vmem:[#allocation13] sm:$0xff] }
  0x72   : > { %836 = vmatmul.msk.f32.vlgmr.msrb.gmra.mxu1 %vm518_vm1, %v462_v23  ;;  %608 = vmatpush.msra.mxu2 %v597_v26 }
  0x73   : > { %628 = vmatpush.msra.mxu3 %v581_v27 }
  0x74   : > { %609 = vmatpush.msra.mxu2 %v596_v28 }
  0x75   : > { %629 = vmatpush.msra.mxu3 %v580_v29 }
  0x76   : > { %610 = vmatpush.msra.mxu2 %v595_v30 }
  0x77   : > { %630 = vmatpush.msra.mxu3 %v579_v31 }
  0x78   : > { %611 = vmatpush.msra.mxu2 %v594_v32 }
  0x79   : > { %631 = vmatpush.msra.mxu3 %v578_v33 }
  0x7a   : > { %612 = vmatpush.msra.mxu2 %v593_v34 }
  0x7b   : > { %632 = vmatpush.msra.mxu3 %v577_v35 }
  0x7c   : > { %613 = vmatpush.msra.mxu2 %v592_v36 }
  0x7d   : > { %633 = vmatpush.msra.mxu3 %v576_v37 }
  0x7e   : > { %614 = vmatpush.msra.mxu2 %v591_v38 }
  0x7f   : > { %634 = vmatpush.msra.mxu3 %v575_v39 }
  0x80   : > { %615 = vmatpush.msra.mxu2 %v590_v40 }
  0x81   : > { %635 = vmatpush.msra.mxu3 %v574_v41 }
  0x82   : > { %616 = vmatpush.msra.mxu2 %v589_v42 }
  0x83   : > { %636 = vmatpush.msra.mxu3 %v573_v43 }
  0x84   : > { %617 = vmatpush.msra.mxu2 %v588_v44 }
  0x85   : > { %637 = vmatpush.msra.mxu3 %v572_v45 }
  0x86   : > { %618 = vmatpush.msra.mxu2 %v587_v46 }
  0x87   : > { %638 = vmatpush.msra.mxu3 %v571_v47 }
  0xe6   : > { %v488_v48 = vpop.f32.mrf.mxu0 }
  0xe7   : > { %v512_v49 = vpop.f32.mrf.mxu1 }
  0xee   : > { %v539_v50 = vpop.f32.mrf.mxu0 }
  0xef   : > { %v562_v51 = vpop.f32.mrf.mxu1  ;;  %v565_v52 = vmul.f32 %v539_v50, %v488_v48  ;;  %v569_v53 = vmul.f32 %v539_v50, %v512_v49 }
  0xf0   : > { %v566_v54 = vmul.f32 %v562_v51, %v512_v49  ;;  %v568_v55 = vmul.f32 %v562_v51, %v488_v48 }
  0xf2   : > { %v570_v56 = vadd.f32 %v569_v53, %v568_v55  ;;  %v567_v57 = vsub.f32 %v565_v52, %v566_v54 }
  0xf4   : > { %619 = vmatmul.f32.vlgmr.msra.gmra.mxu2 %v570_v56  ;;  %639 = vmatmul.f32.vlgmr.msra.gmra.mxu3 %v567_v57 }
 0x177   : > { %v620_v58 = vpop.f32.mrf.mxu2  ;;  %v640_v59 = vpop.f32.mrf.mxu3 }
 0x178   : > { %v641_v60 = vadd.f32 %v640_v59, %v620_v58 }
 0x17a   : > { %643 = vst [vmem:[%s460_s26] sm:$0xff] %v641_v60 }
 0x17b   : > { %1222 = shalt.err (!%p1219_p10)
}
 0x17c   : > { %869 = dma.vmem_to_hbm [thread:$0]  (%p1451_p4), %s658_s24, 128, %s660_s19, %s645_s14  }
 0x17d PF: > { %s671_s4 = sand.u32 1, %s1269_s27   ;;  %p1602_p11 = scmp.ge.s32.totalorder %s1281_s30, 2 }
 0x17e   : > { %s672_s22 = scalar_lea.sflag [#allocation4], %s671_s4 }
 0x17f   : > { %p898_p5 = pnand %p1602_p11, %p1455_p6 }
 0x181   : > { %p899_p13 = pneg %p898_p5 }
 0x183   : > { %1264 = dma.done.wait (%p899_p13), %s672_s22, 128  }
 0x184   : > { %1266 = vsyncadd (%p899_p13), %s672_s22, 4294967168  ;;  %s1603_s18 = sld [smem:[#allocation24_spill]]  ;;  %p27_p0 = scmp.ge.s32.totalorder %s1425_s11, 4  }
 0x185   : > { %s1604_s27 = smov %s1273_s28  ;;  %s1605_s28 = smov %s1277_s29 }
 0x186   : > { %s1607_s30 = smov %s1425_s11  ;;  %29 = sbr.rel (!%p27_p0) target bundleno = 17 (0x11), region = 134 }
 0x18a   : > { %s1606_s29 = smov %s1603_s18 }
 0x18b   :  { %678 = vsyncpa [#allocation3], 1 }
 0x18c   :  { %680 = vsyncpa [#allocation3 + $0x1], 1 }
 0x18d   :  { %681 = vsyncpa [#allocation6], 1 }
 0x18e   :  { %683 = vsyncpa [#allocation6 + $0x1], 1 }
 0x18f   :  { %684 = vsyncpa [#allocation9], 1 }
 0x190   :  { %685 = vsyncpa [#allocation12], 1 }
 0x191   :  { %686 = vsyncpa [#allocation15], 1 }
 0x192   :  { %687 = vsyncpa [#allocation4], 1 }
 0x193   :  { %689 = vsyncpa [#allocation4 + $0x1], 1 }

</bundles_post_ra>
